<compile_context>
chip_gen: v5e
topology: v5e:2x2
jax: 0.10.0
libtpu: 0.0.40
codegen_flags: <defaults>
</compile_context>

<pallas_src>
import functools
import math

import jax
import jax.numpy as jnp
from jax.experimental import pallas as pl
from jax.experimental.pallas import tpu as pltpu

_LANE = 128     # lane (last-dim) granularity
_SUBLANE = 8    # sublane granularity
_VMEM_BUDGET = 48 * 1024 * 1024   # conservative: v7x has 64 MiB per TensorCore


def _round_up(x, m):
    return (x + m - 1) // m * m


def _make_encoder_kernel(num_layers):
    """Fused [Linear -> ReLU] * num_layers kernel.

    Ref signature: (x_ref, w0, b0, w1, b1, ..., o_ref).
    The activation tile lives on-chip (vregs/VMEM) across all layers.
    """
    def kernel(*refs):
        x_ref = refs[0]
        o_ref = refs[-1]
        param_refs = refs[1:-1]
        h = x_ref[...]                       # bf16 input tile, no cast needed
        for l in range(num_layers):
            w_ref = param_refs[2 * l]        # (in_pad, out_pad) bf16
            b_ref = param_refs[2 * l + 1]    # (1, out_pad)      f32
            y = jnp.dot(h, w_ref[...], preferred_element_type=jnp.float32)
            y = jnp.maximum(y + b_ref[...], 0.0)
            # Carry inter-layer activations in bf16 (next matmul operand is
            # bf16 either way); keep the LAST layer's output f32 for the store.
            h = y if l == num_layers - 1 else y.astype(jnp.bfloat16)
        o_ref[...] = h.astype(o_ref.dtype)
    return kernel


def init_encoder_params(key, input_size, code_size, hidden_sizes=()):
    """nn.Linear-style init; weights stored transposed (in, out), bf16,
    zero-padded to lane-dense (multiple-of-128) feature dims.

    NOTE: bf16 weights deviate from fp32 nn.Linear -- deliberate precision
    choice (f32 accumulation on the MXU keeps error small).
    # TODO(synk): on v7x, fp8 weights + per-layer scale folded into the bias
    # epilogue would halve resident weight VMEM again if accuracy allows.
    """
    sizes = [input_size] + list(hidden_sizes) + [code_size]
    padded = [_round_up(s, _LANE) for s in sizes]
    params = []
    for l in range(len(sizes) - 1):
        d_in, d_out = sizes[l], sizes[l + 1]
        p_in, p_out = padded[l], padded[l + 1]
        key, wk, bk = jax.random.split(key, 3)
        bound = 1.0 / math.sqrt(d_in)
        w = jax.random.uniform(wk, (d_in, d_out), jnp.float32, -bound, bound)
        b = jax.random.uniform(bk, (d_out,), jnp.float32, -bound, bound)
        w_p = jnp.zeros((p_in, p_out), jnp.float32).at[:d_in, :d_out].set(w)
        b_p = jnp.zeros((1, p_out), jnp.float32).at[0, :d_out].set(b)
        params.append((w_p.astype(jnp.bfloat16), b_p))
    return params


def _const_spec(shape, single_buffer):
    """BlockSpec for a block fetched once (constant index_map). Request a
    single buffer (no revisits -> no need to double-buffer) when supported."""
    if single_buffer:
        try:
            return pl.BlockSpec(shape, lambda i: (0, 0),
                                pipeline_mode=pl.Buffered(1))
        except (AttributeError, TypeError):   # older JAX without Buffered
            pass
    return pl.BlockSpec(shape, lambda i: (0, 0))


def _vmem_bytes(tm, in_pad, out_pad, params, single_buffer_weights):
    """Rough resident-VMEM estimate for a given batch tile size."""
    wbuf = 1 if single_buffer_weights else 2
    weight_bytes = wbuf * sum(
        w.size * w.dtype.itemsize + b.size * b.dtype.itemsize
        for (w, b) in params)
    x_tile = 2 * tm * in_pad * 2          # bf16 input, double-buffered
    o_tile = 2 * tm * out_pad * 4         # f32 output, double-buffered
    widest = max(max(w.shape) for (w, _) in params)
    act = 3 * tm * widest * 4             # f32 accum + bf16 copies headroom
    return weight_bytes + x_tile + o_tile + act


def _choose_tm(batch, tm_max=1024):
    """Batch tile: minimize padding waste (<8 wasted rows per tile) and keep
    >=2 grid steps when batch allows so both v7x TensorCores get work.
    NOTE: the small-batch (tm=8) path is MXU-starved by construction (M=8
    fills a tiny fraction of a 256-high MXU pass); it is latency-, not
    throughput-, oriented."""
    if batch <= _SUBLANE:
        return _round_up(batch, _SUBLANE)
    nt = max(2, -(-batch // tm_max))          # >=2 steps, cap tile at tm_max
    return _round_up(-(-batch // nt), _SUBLANE)


@functools.partial(jax.jit,
                   static_argnames=("code_size", "single_buffer_weights"))
def encoder_forward(x, params, *, code_size, single_buffer_weights=True):
    """Encoder.forward: one fused Pallas kernel for the whole layer stack."""
    batch, in_features = x.shape
    num_layers = len(params)
    in_pad = params[0][0].shape[0]
    out_pad = params[-1][0].shape[1]

    # ---- tile / VMEM budgeting -------------------------------------------
    tm = _choose_tm(batch)
    while tm > _SUBLANE and _vmem_bytes(tm, in_pad, out_pad, params,
                                        single_buffer_weights) > _VMEM_BUDGET:
        tm = max(_SUBLANE, _round_up(tm // 2, _SUBLANE))
    # TODO(synk): if the weights ALONE exceed the 48 MiB budget (huge layers),
    # switch the biggest layer to an N/K-tiled pltpu.emit_pipeline instead of
    # the weights-resident strategy.
    batch_pad = _round_up(batch, tm)
    grid = (batch_pad // tm,)

    need = _vmem_bytes(tm, in_pad, out_pad, params, single_buffer_weights)
    vmem_limit = max(32 * 1024 * 1024,
                     min(int(need * 1.25) + (2 << 20), 64 * 1024 * 1024))

    # ---- input: pad (if needed) + cast to bf16 in one fused wrapper pass --
    x_p = x
    if (batch_pad, in_pad) != (batch, in_features):
        x_p = jnp.pad(x, ((0, batch_pad - batch), (0, in_pad - in_features)))
    x_p = x_p.astype(jnp.bfloat16)

    # ---- specs -------------------------------------------------------------
    in_specs = [pl.BlockSpec((tm, in_pad), lambda i: (i, 0))]   # x tile
    flat_params = []
    for (w, b) in params:
        d_in, d_out = w.shape
        # Constant index_map -> each weight/bias is DMA'd once and stays
        # VMEM-resident for every batch tile (single-buffered).
        in_specs.append(_const_spec((d_in, d_out), single_buffer_weights))
        in_specs.append(_const_spec((1, d_out), single_buffer_weights))
        flat_params.extend((w, b))

    out_specs = pl.BlockSpec((tm, out_pad), lambda i: (i, 0))

    # ---- cost estimate ------------------------------------------------------
    flops = 0
    param_bytes = 0
    for (w, b) in params:
        d_in, d_out = w.shape
        flops += 2 * batch_pad * d_in * d_out
        param_bytes += w.size * w.dtype.itemsize + b.size * b.dtype.itemsize
    bytes_accessed = (x_p.size * x_p.dtype.itemsize
                      + param_bytes
                      + batch_pad * out_pad * x.dtype.itemsize)

    out = pl.pallas_call(
        _make_encoder_kernel(num_layers),
        out_shape=jax.ShapeDtypeStruct((batch_pad, out_pad), x.dtype),
        grid_spec=pltpu.PrefetchScalarGridSpec(
            num_scalar_prefetch=0,
            grid=grid,
            in_specs=in_specs,
            out_specs=out_specs,
        ),
        compiler_params=pltpu.CompilerParams(
            dimension_semantics=("parallel",),
            vmem_limit_bytes=vmem_limit,
        ),
        cost_estimate=pl.CostEstimate(
            flops=flops, transcendentals=0, bytes_accessed=bytes_accessed),
    )(x_p, *flat_params)

    # NOTE: callers that can consume the padded (batch_pad, out_pad) slab
    # directly should do so and skip this extra HBM pass; we slice here to
    # keep the module's exact (batch, code_size) contract.
    return out[:batch, :code_size]


def _reference_forward(x, params, code_size):
    """Pure-JAX reference mirroring the kernel math exactly
    (bf16 inputs/activations, f32-accumulated matmuls, f32 last layer)."""
    in_pad = params[0][0].shape[0]
    h = jnp.pad(x, ((0, 0), (0, in_pad - x.shape[1]))).astype(jnp.bfloat16)
    for l, (w, b) in enumerate(params):
        y = jnp.dot(h, w, preferred_element_type=jnp.float32)
        y = jnp.maximum(y + b.astype(jnp.float32), 0.0)
        h = y if l == len(params) - 1 else y.astype(jnp.bfloat16)
    return h[:, :code_size].astype(x.dtype)


if __name__ == "__main__":
    # Encoder(input_size=32, code_size=16, hidden_sizes=[64]) on a (8, 32) input.
    key = jax.random.PRNGKey(0)
    key, xk = jax.random.split(key)

    batch, input_size, code_size = 8, 32, 16
    hidden_sizes = [64]

    x = jax.random.normal(xk, (batch, input_size), jnp.float32)
    params = init_encoder_params(key, input_size, code_size, hidden_sizes)

    def _run(single_buffer):
        return jax.block_until_ready(
            encoder_forward(x, params, code_size=code_size,
                            single_buffer_weights=single_buffer))

    try:
        out = _run(True)
    except Exception:
        # Fallback if single-buffered (Buffered(1)) weight blocks are not
        # supported by the installed Pallas lowering.
        out = _run(False)

    ref = _reference_forward(x, params, code_size)
    assert out.shape == (batch, code_size)
    # bf16 matmul (f32 accumulation) -> allow small deviation vs reference.
    assert jnp.allclose(out, ref, atol=2e-2, rtol=2e-2), "mismatch vs reference"

    print("KERNEL_OK")
</pallas_src>

<mosaic_0001>
module attributes {stable_mosaic.version = 11 : i64} {
  func.func @kernel(%arg0: i32, %arg1: memref<8x128xbf16, #tpu.memory_space<vmem>>, %arg2: memref<128x128xbf16, #tpu.memory_space<vmem>>, %arg3: memref<1x128xf32, #tpu.memory_space<vmem>>, %arg4: memref<128x128xbf16, #tpu.memory_space<vmem>>, %arg5: memref<1x128xf32, #tpu.memory_space<vmem>>, %arg6: memref<8x128xf32, #tpu.memory_space<vmem>>) attributes {dimension_semantics = [#tpu.dimension_semantics<parallel>], iteration_bounds = array<i64: 1>, scalar_prefetch = 0 : i64, scratch_operands = 0 : i64, tpu.core_type = #tpu.core_type<tc>, window_params = [{transform_indices = @transform_0, window_bounds = array<i64: 8, 128>}, {pipeline_mode = #tpu.pipeline_mode<synchronous>, transform_indices = @transform_1, window_bounds = array<i64: 128, 128>}, {pipeline_mode = #tpu.pipeline_mode<synchronous>, transform_indices = @transform_2, window_bounds = array<i64: 1, 128>}, {pipeline_mode = #tpu.pipeline_mode<synchronous>, transform_indices = @transform_3, window_bounds = array<i64: 128, 128>}, {pipeline_mode = #tpu.pipeline_mode<synchronous>, transform_indices = @transform_4, window_bounds = array<i64: 1, 128>}, {transform_indices = @transform_5, window_bounds = array<i64: 8, 128>}]} {
    %c0 = arith.constant 0 : index
    %c0_0 = arith.constant 0 : index
    %0 = vector.load %arg1[%c0, %c0_0] : memref<8x128xbf16, #tpu.memory_space<vmem>>, vector<8x128xbf16>
    %c0_1 = arith.constant 0 : index
    %c0_2 = arith.constant 0 : index
    %1 = vector.load %arg2[%c0_1, %c0_2] : memref<128x128xbf16, #tpu.memory_space<vmem>>, vector<128x128xbf16>
    %cst = arith.constant dense<0.000000e+00> : vector<8x128xf32>
    %2 = tpu.matmul %0, %1, %cst {dimension_numbers = #tpu.dot_dimension_numbers<[1], [0], [0], [1], [0, 0, 1, 1], [], []>} : vector<8x128xbf16>, vector<128x128xbf16>, vector<8x128xf32> -> vector<8x128xf32>
    %c0_3 = arith.constant 0 : index
    %c0_4 = arith.constant 0 : index
    %3 = vector.load %arg3[%c0_3, %c0_4] : memref<1x128xf32, #tpu.memory_space<vmem>>, vector<1x128xf32>
    %4 = vector.broadcast %3 : vector<1x128xf32> to vector<8x128xf32>
    %5 = arith.addf %2, %4 : vector<8x128xf32>
    %cst_5 = arith.constant 0.000000e+00 : f32
    %6 = vector.broadcast %cst_5 : f32 to vector<8x128xf32>
    %7 = arith.maximumf %5, %6 : vector<8x128xf32>
    %8 = arith.truncf %7 : vector<8x128xf32> to vector<8x128xbf16>
    %c0_6 = arith.constant 0 : index
    %c0_7 = arith.constant 0 : index
    %9 = vector.load %arg4[%c0_6, %c0_7] : memref<128x128xbf16, #tpu.memory_space<vmem>>, vector<128x128xbf16>
    %cst_8 = arith.constant dense<0.000000e+00> : vector<8x128xf32>
    %10 = tpu.matmul %8, %9, %cst_8 {dimension_numbers = #tpu.dot_dimension_numbers<[1], [0], [0], [1], [0, 0, 1, 1], [], []>} : vector<8x128xbf16>, vector<128x128xbf16>, vector<8x128xf32> -> vector<8x128xf32>
    %c0_9 = arith.constant 0 : index
    %c0_10 = arith.constant 0 : index
    %11 = vector.load %arg5[%c0_9, %c0_10] : memref<1x128xf32, #tpu.memory_space<vmem>>, vector<1x128xf32>
    %12 = vector.broadcast %11 : vector<1x128xf32> to vector<8x128xf32>
    %13 = arith.addf %10, %12 : vector<8x128xf32>
    %cst_11 = arith.constant 0.000000e+00 : f32
    %14 = vector.broadcast %cst_11 : f32 to vector<8x128xf32>
    %15 = arith.maximumf %13, %14 : vector<8x128xf32>
    %c0_12 = arith.constant 0 : index
    %c0_13 = arith.constant 0 : index
    %16 = vector.load %arg6[%c0_12, %c0_13] : memref<8x128xf32, #tpu.memory_space<vmem>>, vector<8x128xf32>
    tpu.vector_store %arg6[%c0_12, %c0_13], %15 {strides = array<i32>} : memref<8x128xf32, #tpu.memory_space<vmem>>, vector<8x128xf32>,
    return
  }
  func.func @transform_0(%arg0: i32) -> (i32, i32) {
    %c0_i32 = arith.constant 0 : i32
    %c0_i32_0 = arith.constant 0 : i32
    return %arg0, %c0_i32 : i32, i32
  }
  func.func @transform_1(%arg0: i32) -> (i32, i32) {
    %c0_i32 = arith.constant 0 : i32
    %c0_i32_0 = arith.constant 0 : i32
    %c0_i32_1 = arith.constant 0 : i32
    return %c0_i32, %c0_i32_0 : i32, i32
  }
  func.func @transform_2(%arg0: i32) -> (i32, i32) {
    %c0_i32 = arith.constant 0 : i32
    %c0_i32_0 = arith.constant 0 : i32
    %c0_i32_1 = arith.constant 0 : i32
    return %c0_i32, %c0_i32_0 : i32, i32
  }
  func.func @transform_3(%arg0: i32) -> (i32, i32) {
    %c0_i32 = arith.constant 0 : i32
    %c0_i32_0 = arith.constant 0 : i32
    %c0_i32_1 = arith.constant 0 : i32
    return %c0_i32, %c0_i32_0 : i32, i32
  }
  func.func @transform_4(%arg0: i32) -> (i32, i32) {
    %c0_i32 = arith.constant 0 : i32
    %c0_i32_0 = arith.constant 0 : i32
    %c0_i32_1 = arith.constant 0 : i32
    return %c0_i32, %c0_i32_0 : i32, i32
  }
  func.func @transform_5(%arg0: i32) -> (i32, i32) {
    %c0_i32 = arith.constant 0 : i32
    %c0_i32_0 = arith.constant 0 : i32
    return %arg0, %c0_i32 : i32, i32
  }
}

module attributes {stable_mosaic.version = 11 : i64} {
  func.func @kernel(%arg0: i32, %arg1: memref<8x128xbf16, #tpu.memory_space<vmem>>, %arg2: memref<128x128xbf16, #tpu.memory_space<vmem>>, %arg3: memref<1x128xf32, #tpu.memory_space<vmem>>, %arg4: memref<128x128xbf16, #tpu.memory_space<vmem>>, %arg5: memref<1x128xf32, #tpu.memory_space<vmem>>, %arg6: memref<8x128xf32, #tpu.memory_space<vmem>>) attributes {dimension_semantics = [#tpu.dimension_semantics<parallel>], iteration_bounds = array<i64: 1>, scalar_prefetch = 0 : i64, scratch_operands = 0 : i64, tpu.core_type = #tpu.core_type<tc>, window_params = [{transform_indices = @transform_0, window_bounds = array<i64: 8, 128>}, {pipeline_mode = #tpu.pipeline_mode<synchronous>, transform_indices = @transform_1, window_bounds = array<i64: 128, 128>}, {pipeline_mode = #tpu.pipeline_mode<synchronous>, transform_indices = @transform_2, window_bounds = array<i64: 1, 128>}, {pipeline_mode = #tpu.pipeline_mode<synchronous>, transform_indices = @transform_3, window_bounds = array<i64: 128, 128>}, {pipeline_mode = #tpu.pipeline_mode<synchronous>, transform_indices = @transform_4, window_bounds = array<i64: 1, 128>}, {transform_indices = @transform_5, window_bounds = array<i64: 8, 128>}]} {
    %c0 = arith.constant 0 : index
    %c0_0 = arith.constant 0 : index
    %0 = vector.load %arg1[%c0, %c0_0] : memref<8x128xbf16, #tpu.memory_space<vmem>>, vector<8x128xbf16>
    %c0_1 = arith.constant 0 : index
    %c0_2 = arith.constant 0 : index
    %1 = vector.load %arg2[%c0_1, %c0_2] : memref<128x128xbf16, #tpu.memory_space<vmem>>, vector<128x128xbf16>
    %cst = arith.constant dense<0.000000e+00> : vector<8x128xf32>
    %2 = tpu.matmul %0, %1, %cst {dimension_numbers = #tpu.dot_dimension_numbers<[1], [0], [0], [1], [0, 0, 1, 1], [], []>} : vector<8x128xbf16>, vector<128x128xbf16>, vector<8x128xf32> -> vector<8x128xf32>
    %c0_3 = arith.constant 0 : index
    %c0_4 = arith.constant 0 : index
    %3 = vector.load %arg3[%c0_3, %c0_4] : memref<1x128xf32, #tpu.memory_space<vmem>>, vector<1x128xf32>
    %4 = vector.broadcast %3 : vector<1x128xf32> to vector<8x128xf32>
    %5 = arith.addf %2, %4 : vector<8x128xf32>
    %cst_5 = arith.constant 0.000000e+00 : f32
    %6 = vector.broadcast %cst_5 : f32 to vector<8x128xf32>
    %7 = arith.maximumf %5, %6 : vector<8x128xf32>
    %8 = arith.truncf %7 : vector<8x128xf32> to vector<8x128xbf16>
    %c0_6 = arith.constant 0 : index
    %c0_7 = arith.constant 0 : index
    %9 = vector.load %arg4[%c0_6, %c0_7] : memref<128x128xbf16, #tpu.memory_space<vmem>>, vector<128x128xbf16>
    %cst_8 = arith.constant dense<0.000000e+00> : vector<8x128xf32>
    %10 = tpu.matmul %8, %9, %cst_8 {dimension_numbers = #tpu.dot_dimension_numbers<[1], [0], [0], [1], [0, 0, 1, 1], [], []>} : vector<8x128xbf16>, vector<128x128xbf16>, vector<8x128xf32> -> vector<8x128xf32>
    %c0_9 = arith.constant 0 : index
    %c0_10 = arith.constant 0 : index
    %11 = vector.load %arg5[%c0_9, %c0_10] : memref<1x128xf32, #tpu.memory_space<vmem>>, vector<1x128xf32>
    %12 = vector.broadcast %11 : vector<1x128xf32> to vector<8x128xf32>
    %13 = arith.addf %10, %12 : vector<8x128xf32>
    %cst_11 = arith.constant 0.000000e+00 : f32
    %14 = vector.broadcast %cst_11 : f32 to vector<8x128xf32>
    %15 = arith.maximumf %13, %14 : vector<8x128xf32>
    %c0_12 = arith.constant 0 : index
    %c0_13 = arith.constant 0 : index
    %16 = vector.load %arg6[%c0_12, %c0_13] : memref<8x128xf32, #tpu.memory_space<vmem>>, vector<8x128xf32>
    tpu.vector_store %arg6[%c0_12, %c0_13], %15 {strides = array<i32>} : memref<8x128xf32, #tpu.memory_space<vmem>>, vector<8x128xf32>,
    return
  }
  func.func @transform_0(%arg0: i32) -> (i32, i32) {
    %c0_i32 = arith.constant 0 : i32
    %c0_i32_0 = arith.constant 0 : i32
    return %arg0, %c0_i32 : i32, i32
  }
  func.func @transform_1(%arg0: i32) -> (i32, i32) {
    %c0_i32 = arith.constant 0 : i32
    %c0_i32_0 = arith.constant 0 : i32
    %c0_i32_1 = arith.constant 0 : i32
    return %c0_i32, %c0_i32_0 : i32, i32
  }
  func.func @transform_2(%arg0: i32) -> (i32, i32) {
    %c0_i32 = arith.constant 0 : i32
    %c0_i32_0 = arith.constant 0 : i32
    %c0_i32_1 = arith.constant 0 : i32
    return %c0_i32, %c0_i32_0 : i32, i32
  }
  func.func @transform_3(%arg0: i32) -> (i32, i32) {
    %c0_i32 = arith.constant 0 : i32
    %c0_i32_0 = arith.constant 0 : i32
    %c0_i32_1 = arith.constant 0 : i32
    return %c0_i32, %c0_i32_0 : i32, i32
  }
  func.func @transform_4(%arg0: i32) -> (i32, i32) {
    %c0_i32 = arith.constant 0 : i32
    %c0_i32_0 = arith.constant 0 : i32
    %c0_i32_1 = arith.constant 0 : i32
    return %c0_i32, %c0_i32_0 : i32, i32
  }
  func.func @transform_5(%arg0: i32) -> (i32, i32) {
    %c0_i32 = arith.constant 0 : i32
    %c0_i32_0 = arith.constant 0 : i32
    return %arg0, %c0_i32 : i32, i32
  }
}

</mosaic_0001>

<bundles_post_ra>
// kernel: encoder_forward.1
= control target key start
LH: loop header
LB: loop body
LE: loop exit
PB: predicated region body
PF: predicated region fallthrough
CT: control target
= control target key end

     0   :  { %10 = vsyncpa [#allocation3], 0  ;;  %s456_s0 = inlined_call_operand.vmem [shape: bf16[8,128], index: 0, kind: input, shape index: {}]   ;;  %s457_s1 = inlined_call_operand.hbm [shape: bf16[128,128], index: 1, kind: input, shape index: {}]   ;;  %s458_s2 = inlined_call_operand.vmem [shape: f32[1,128], index: 2, kind: input, shape index: {}]   ;;  %s459_s3 = inlined_call_operand.hbm [shape: bf16[128,128], index: 3, kind: input, shape index: {}]   ;;  %s460_s4 = inlined_call_operand.vmem [shape: f32[1,128], index: 4, kind: input, shape index: {}]   ;;  %s461_s5 = inlined_call_operand.hbm [shape: f32[8,128], index: 5, kind: output, shape index: {}]  }
   0x1   :  { %11 = vsyncpa [#allocation6], 0 }
   0x2   :  { %12 = vsyncpa [#allocation4], 0  ;;  %s19_s20 = sshll.u32 %s457_s1, 4  ;;  %s403_s21 = smov [#allocation2]   ;;  %s20_s20 = int_to_ptr.hbm [resolvable:$true] %s19_s20 }
   0x3   :  { %s21_s22 = sshll.u32 %s403_s21, 4  ;;  %s34_s25 = sshll.u32 %s459_s3, 4  ;;  %s22_s22 = int_to_ptr.vmem [resolvable:$true] %s21_s22  ;;  %s35_s25 = int_to_ptr.hbm [resolvable:$true] %s34_s25 }
   0x4   :  { %s404_s26 = smov 64   ;;  %s405_s27 = smov 4  }
   0x5   :  { %27 = dma.hbm_to_vmem [thread:$0]  %s20_s20, 1024, %s22_s22, [#allocation3], %s404_s26, %s404_s26, %s405_s27  }
   0x6   :  { %s406_s28 = smov [#allocation5]  }
   0x7   :  { %s36_s29 = sshll.u32 %s406_s28, 4  ;;  %s37_s29 = int_to_ptr.vmem [resolvable:$true] %s36_s29 }
   0x8   :  { %42 = dma.hbm_to_vmem [thread:$0]  %s35_s25, 1024, %s37_s29, [#allocation6], %s404_s26, %s404_s26, %s405_s27  }
   0x9   :  { %397 = dma.done.wait [#allocation3], 1024  }
   0xa   :  { %398 = vsyncadd [#allocation3], 4294966272 }
   0xb   :  { %399 = dma.done.wait [#allocation6], 1024  }
   0xc   :  { %400 = vsyncadd [#allocation6], 4294966272  ;;  %v309_v0 = vld [vmem:[#allocation2 + $0x38] sm:$0xff]  ;;  %v308_v1 = vld [vmem:[#allocation2 + $0x30] sm:$0xff]  ;;  %s227_s12 = sshll.u32 %s461_s5, 4  ;;  %s228_s12 = int_to_ptr.hbm [resolvable:$true] %s227_s12 }
   0xd   :  { %122 = vmatpush.bf16.msra.mxu0 %v309_v0  ;;  %v317_v2 = vld [vmem:[#allocation5 + $0x38] sm:$0xff]  ;;  %v316_v3 = vld [vmem:[#allocation5 + $0x30] sm:$0xff]  ;;  %v307_v4 = vld [vmem:[#allocation2 + $0x28] sm:$0xff] }
   0xe   :  { %205 = vmatpush.bf16.msra.mxu1 %v317_v2  ;;  %v315_v5 = vld [vmem:[#allocation5 + $0x28] sm:$0xff]  ;;  %v306_v6 = vld [vmem:[#allocation2 + $0x20] sm:$0xff]  ;;  %v305_v8 = vld [vmem:[#allocation2 + $0x18] sm:$0xff] }
   0xf   :  { %v314_v7 = vld [vmem:[#allocation5 + $0x20] sm:$0xff]  ;;  %v313_v9 = vld [vmem:[#allocation5 + $0x18] sm:$0xff]  ;;  %v304_v10 = vld [vmem:[#allocation2 + $0x10] sm:$0xff] }
  0x10   :  { %v312_v11 = vld [vmem:[#allocation5 + $0x10] sm:$0xff]  ;;  %v303_v12 = vld [vmem:[#allocation2 + $0x8] sm:$0xff]  ;;  %v302_v13 = vld [vmem:[#allocation2] sm:$0xff] }
  0x11   :  { %123 = vmatpush.bf16.msra.mxu0 %v308_v1  ;;  %v53_v14 = vld [vmem:[%s456_s0] sm:$0xf]  ;;  %v311_v15 = vld [vmem:[#allocation5 + $0x8] sm:$0xff]  ;;  %s407_s0 = smov [#allocation7]  }
  0x12   :  { %206 = vmatpush.bf16.msra.mxu1 %v316_v3  ;;  %v310_v16 = vld [vmem:[#allocation5] sm:$0xff]  ;;  %s225_s9 = sshll.u32 %s407_s0, 4  ;;  %s226_s9 = int_to_ptr.vmem [resolvable:$true] %s225_s9 }
  0x13   :  { %v323_v17 = vld [vmem:[%s458_s2] ss:$0 sm:$0xff] }
  0x14   :  { %v324_v23 = vld [vmem:[%s460_s4] ss:$0 sm:$0xff] }
  0x15   :  { %124 = vmatpush.bf16.msra.mxu0 %v307_v4 }
  0x16   :  { %207 = vmatpush.bf16.msra.mxu1 %v315_v5 }
  0x19   :  { %125 = vmatpush.bf16.msra.mxu0 %v306_v6 }
  0x1a   :  { %208 = vmatpush.bf16.msra.mxu1 %v314_v7 }
  0x1d   :  { %126 = vmatpush.bf16.msra.mxu0 %v305_v8 }
  0x1e   :  { %209 = vmatpush.bf16.msra.mxu1 %v313_v9 }
  0x21   :  { %127 = vmatpush.bf16.msra.mxu0 %v304_v10 }
  0x22   :  { %210 = vmatpush.bf16.msra.mxu1 %v312_v11 }
  0x25   :  { %128 = vmatpush.bf16.msra.mxu0 %v303_v12 }
  0x26   :  { %211 = vmatpush.bf16.msra.mxu1 %v311_v15 }
  0x29   :  { %129 = vmatpush.bf16.msra.mxu0 %v302_v13 }
  0x2a   :  { %212 = vmatpush.bf16.msra.mxu1 %v310_v16 }
  0x2c   :  { %130 = vmatmul.bf16.vlgmr.msra.gmra.mxu0 %v53_v14 }
  0xa9   :  { %v131_v18 = vpop.f32.mrf.mxu0 }
  0xaa   :  { %v132_v19 = vadd.f32 %v323_v17, %v131_v18 }
  0xac   :  { %v135_v20 = vmax.f32 %v132_v19, 0.0 }
  0xae   :  { %v136_v21 = vpack.c.bf16 %v135_v20, %v135_v20 }
  0xb0   :  { %213 = vmatmul.bf16.vlgmr.msra.gmra.mxu1 %v136_v21 }
  0xb1   :  { %v133_v22 = vpop.f32.mrf.mxu0 }
 0x12d   :  { %v214_v24 = vpop.f32.mrf.mxu1 }
 0x12e   :  { %v215_v25 = vadd.f32 %v324_v23, %v214_v24 }
 0x130   :  { %v218_v26 = vmax.f32 %v215_v25, 0.0 }
 0x132   :  { %219 = vst [vmem:[#allocation7] sm:$0xff] %v218_v26 }
 0x133   :  { %230 = dma.vmem_to_hbm [thread:$0]  %s226_s9, 128, %s228_s12, [#allocation4]  }
 0x135   :  { %v216_v27 = vpop.f32.mrf.mxu1 }
 0x136   :  { %401 = dma.done.wait [#allocation4], 128  }
 0x137   :  { %402 = vsyncadd [#allocation4], 4294967168 }
 0x138   :  { %235 = vsyncpa [#allocation3], 1 }
 0x139   :  { %236 = vsyncpa [#allocation6], 1 }
 0x13a   :  { %237 = vsyncpa [#allocation4], 1 }

// kernel: encoder_forward.1
= control target key start
LH: loop header
LB: loop body
LE: loop exit
PB: predicated region body
PF: predicated region fallthrough
CT: control target
= control target key end

     0   :  { %10 = vsyncpa [#allocation3], 0  ;;  %s456_s0 = inlined_call_operand.vmem [shape: bf16[8,128], index: 0, kind: input, shape index: {}]   ;;  %s457_s1 = inlined_call_operand.hbm [shape: bf16[128,128], index: 1, kind: input, shape index: {}]   ;;  %s458_s2 = inlined_call_operand.vmem [shape: f32[1,128], index: 2, kind: input, shape index: {}]   ;;  %s459_s3 = inlined_call_operand.hbm [shape: bf16[128,128], index: 3, kind: input, shape index: {}]   ;;  %s460_s4 = inlined_call_operand.vmem [shape: f32[1,128], index: 4, kind: input, shape index: {}]   ;;  %s461_s5 = inlined_call_operand.hbm [shape: f32[8,128], index: 5, kind: output, shape index: {}]  }
   0x1   :  { %11 = vsyncpa [#allocation6], 0 }
   0x2   :  { %12 = vsyncpa [#allocation4], 0  ;;  %s19_s20 = sshll.u32 %s457_s1, 4  ;;  %s403_s21 = smov [#allocation2]   ;;  %s20_s20 = int_to_ptr.hbm [resolvable:$true] %s19_s20 }
   0x3   :  { %s21_s22 = sshll.u32 %s403_s21, 4  ;;  %s34_s25 = sshll.u32 %s459_s3, 4  ;;  %s22_s22 = int_to_ptr.vmem [resolvable:$true] %s21_s22  ;;  %s35_s25 = int_to_ptr.hbm [resolvable:$true] %s34_s25 }
   0x4   :  { %s404_s26 = smov 64   ;;  %s405_s27 = smov 4  }
   0x5   :  { %27 = dma.hbm_to_vmem [thread:$0]  %s20_s20, 1024, %s22_s22, [#allocation3], %s404_s26, %s404_s26, %s405_s27  }
   0x6   :  { %s406_s28 = smov [#allocation5]  }
   0x7   :  { %s36_s29 = sshll.u32 %s406_s28, 4  ;;  %s37_s29 = int_to_ptr.vmem [resolvable:$true] %s36_s29 }
   0x8   :  { %42 = dma.hbm_to_vmem [thread:$0]  %s35_s25, 1024, %s37_s29, [#allocation6], %s404_s26, %s404_s26, %s405_s27  }
   0x9   :  { %397 = dma.done.wait [#allocation3], 1024  }
   0xa   :  { %398 = vsyncadd [#allocation3], 4294966272 }
   0xb   :  { %399 = dma.done.wait [#allocation6], 1024  }
   0xc   :  { %400 = vsyncadd [#allocation6], 4294966272  ;;  %v309_v0 = vld [vmem:[#allocation2 + $0x38] sm:$0xff]  ;;  %v308_v1 = vld [vmem:[#allocation2 + $0x30] sm:$0xff]  ;;  %s227_s12 = sshll.u32 %s461_s5, 4  ;;  %s228_s12 = int_to_ptr.hbm [resolvable:$true] %s227_s12 }
   0xd   :  { %122 = vmatpush.bf16.msra.mxu0 %v309_v0  ;;  %v317_v2 = vld [vmem:[#allocation5 + $0x38] sm:$0xff]  ;;  %v316_v3 = vld [vmem:[#allocation5 + $0x30] sm:$0xff]  ;;  %v307_v4 = vld [vmem:[#allocation2 + $0x28] sm:$0xff] }
   0xe   :  { %205 = vmatpush.bf16.msra.mxu1 %v317_v2  ;;  %v315_v5 = vld [vmem:[#allocation5 + $0x28] sm:$0xff]  ;;  %v306_v6 = vld [vmem:[#allocation2 + $0x20] sm:$0xff]  ;;  %v305_v8 = vld [vmem:[#allocation2 + $0x18] sm:$0xff] }
   0xf   :  { %v314_v7 = vld [vmem:[#allocation5 + $0x20] sm:$0xff]  ;;  %v313_v9 = vld [vmem:[#allocation5 + $0x18] sm:$0xff]  ;;  %v304_v10 = vld [vmem:[#allocation2 + $0x10] sm:$0xff] }
  0x10   :  { %v312_v11 = vld [vmem:[#allocation5 + $0x10] sm:$0xff]  ;;  %v303_v12 = vld [vmem:[#allocation2 + $0x8] sm:$0xff]  ;;  %v302_v13 = vld [vmem:[#allocation2] sm:$0xff] }
  0x11   :  { %123 = vmatpush.bf16.msra.mxu0 %v308_v1  ;;  %v53_v14 = vld [vmem:[%s456_s0] sm:$0xf]  ;;  %v311_v15 = vld [vmem:[#allocation5 + $0x8] sm:$0xff]  ;;  %s407_s0 = smov [#allocation7]  }
  0x12   :  { %206 = vmatpush.bf16.msra.mxu1 %v316_v3  ;;  %v310_v16 = vld [vmem:[#allocation5] sm:$0xff]  ;;  %s225_s9 = sshll.u32 %s407_s0, 4  ;;  %s226_s9 = int_to_ptr.vmem [resolvable:$true] %s225_s9 }
  0x13   :  { %v323_v17 = vld [vmem:[%s458_s2] ss:$0 sm:$0xff] }
  0x14   :  { %v324_v23 = vld [vmem:[%s460_s4] ss:$0 sm:$0xff] }
  0x15   :  { %124 = vmatpush.bf16.msra.mxu0 %v307_v4 }
  0x16   :  { %207 = vmatpush.bf16.msra.mxu1 %v315_v5 }
  0x19   :  { %125 = vmatpush.bf16.msra.mxu0 %v306_v6 }
  0x1a   :  { %208 = vmatpush.bf16.msra.mxu1 %v314_v7 }
  0x1d   :  { %126 = vmatpush.bf16.msra.mxu0 %v305_v8 }
  0x1e   :  { %209 = vmatpush.bf16.msra.mxu1 %v313_v9 }
  0x21   :  { %127 = vmatpush.bf16.msra.mxu0 %v304_v10 }
  0x22   :  { %210 = vmatpush.bf16.msra.mxu1 %v312_v11 }
  0x25   :  { %128 = vmatpush.bf16.msra.mxu0 %v303_v12 }
  0x26   :  { %211 = vmatpush.bf16.msra.mxu1 %v311_v15 }
  0x29   :  { %129 = vmatpush.bf16.msra.mxu0 %v302_v13 }
  0x2a   :  { %212 = vmatpush.bf16.msra.mxu1 %v310_v16 }
  0x2c   :  { %130 = vmatmul.bf16.vlgmr.msra.gmra.mxu0 %v53_v14 }
  0xa9   :  { %v131_v18 = vpop.f32.mrf.mxu0 }
  0xaa   :  { %v132_v19 = vadd.f32 %v323_v17, %v131_v18 }
  0xac   :  { %v135_v20 = vmax.f32 %v132_v19, 0.0 }
  0xae   :  { %v136_v21 = vpack.c.bf16 %v135_v20, %v135_v20 }
  0xb0   :  { %213 = vmatmul.bf16.vlgmr.msra.gmra.mxu1 %v136_v21 }
  0xb1   :  { %v133_v22 = vpop.f32.mrf.mxu0 }
 0x12d   :  { %v214_v24 = vpop.f32.mrf.mxu1 }
 0x12e   :  { %v215_v25 = vadd.f32 %v324_v23, %v214_v24 }
 0x130   :  { %v218_v26 = vmax.f32 %v215_v25, 0.0 }
 0x132   :  { %219 = vst [vmem:[#allocation7] sm:$0xff] %v218_v26 }
 0x133   :  { %230 = dma.vmem_to_hbm [thread:$0]  %s226_s9, 128, %s228_s12, [#allocation4]  }
 0x135   :  { %v216_v27 = vpop.f32.mrf.mxu1 }
 0x136   :  { %401 = dma.done.wait [#allocation4], 128  }
 0x137   :  { %402 = vsyncadd [#allocation4], 4294967168 }
 0x138   :  { %235 = vsyncpa [#allocation3], 1 }
 0x139   :  { %236 = vsyncpa [#allocation6], 1 }
 0x13a   :  { %237 = vsyncpa [#allocation4], 1 }

</bundles_post_ra>
